<compile_context>
chip_gen: v6e
topology: v6e:2x2x1
jax: 0.10.0
libtpu: 0.0.40
codegen_flags: <defaults>
</compile_context>

<pallas_src>
import math

import jax
import jax.numpy as jnp
from jax import lax
from jax.experimental import pallas as pl
from jax.experimental.pallas import tpu as pltpu


# ----------------------------------------------------------------------------
# Fused multi-head attention kernel (one grid step == one batch element)
# ----------------------------------------------------------------------------
def _make_mha_kernel(n_heads, d_head, scale, use_bias, has_out):
    d = n_heads * d_head

    def kernel(*refs):
        it = iter(refs)
        xq_ref = next(it)                    # (1, Nq, D)
        xkv_ref = next(it)                   # (1, Nkv, D)
        wq_ref = next(it)                    # (D, D)   (in, out)
        wkv_ref = next(it)                   # (D, 2D)  (in, out) for [K | V]
        bq_ref = next(it) if use_bias else None          # (1, D)
        bkv_ref = next(it) if use_bias else None         # (1, 2D)
        wout_ref = next(it) if has_out else None         # (D, D)
        bout_ref = next(it) if (has_out and use_bias) else None  # (1, D)
        o_ref = next(it)                     # (1, Nq, D)

        xq = xq_ref[0]                       # (Nq, D)
        xkv = xkv_ref[0]                     # (Nkv, D)

        # Projections: plain x @ W, no transpose inside the kernel.
        q = jnp.dot(xq, wq_ref[...], preferred_element_type=jnp.float32)
        kv = jnp.dot(xkv, wkv_ref[...], preferred_element_type=jnp.float32)
        if use_bias:
            q = q + bq_ref[...]
            kv = kv + bkv_ref[...]
        # Fold the 1/sqrt(d_head) scale into Q once (cheaper than scaling each
        # per-head (Nq, Nkv) score matrix).
        q = q * scale
        k = kv[:, :d]                        # (Nkv, D)
        v = kv[:, d:]                        # (Nkv, D)

        # Per-head scaled-dot-product attention (static loop, lane slices).
        acc = None
        for h in range(n_heads):
            lo = h * d_head
            hi = lo + d_head
            qh = q[:, lo:hi]                 # (Nq, dh)
            kh = k[:, lo:hi]                 # (Nkv, dh)
            vh = v[:, lo:hi]                 # (Nkv, dh)
            # q @ k^T via dot_general (contract last dims; no explicit transpose).
            s = lax.dot_general(
                qh, kh, (((1,), (1,)), ((), ())),
                preferred_element_type=jnp.float32)
            m = jnp.max(s, axis=-1, keepdims=True)
            p = jnp.exp(s - m)
            denom = jnp.sum(p, axis=-1, keepdims=True)
            p = p * pl.reciprocal(denom, approx=True)
            out_h = jnp.dot(p, vh, preferred_element_type=jnp.float32)   # (Nq, dh)
            if has_out:
                # Fold the "mixing" projection into the head loop; avoids the
                # lane-concatenate of head outputs (same FLOPs on the MXU).
                contrib = jnp.dot(out_h, wout_ref[lo:hi, :],
                                  preferred_element_type=jnp.float32)    # (Nq, D)
                acc = contrib if acc is None else acc + contrib
            else:
                acc = out_h                  # n_heads == 1: spans all lanes

        x = acc                              # (Nq, D)
        if has_out and use_bias:
            x = x + bout_ref[...]

        # Single lane-dense store of the full (Nq, D) output block.
        o_ref[0] = x.astype(o_ref.dtype)

    return kernel


# ----------------------------------------------------------------------------
# MultiheadAttention module (JAX wrapper around the fused Pallas kernel)
# ----------------------------------------------------------------------------
class MultiheadAttentionPallas:
    def __init__(self, *, d_token, n_heads, dropout, bias, initialization, key):
        assert initialization in ("kaiming", "xavier")
        if n_heads > 1:
            assert d_token % n_heads == 0
        self.d_token = d_token
        self.n_heads = n_heads
        self.dropout = dropout  # TODO(synk): attention-prob dropout not applied (eval / dropout=0).
        self.use_bias = bias

        keys = jax.random.split(key, 4)
        has_out = n_heads > 1

        def init_weight(k, use_xavier_half_gain):
            if initialization == "xavier" and use_xavier_half_gain:
                # xavier_uniform with gain = 1/sqrt(2)
                limit = (1.0 / math.sqrt(2.0)) * math.sqrt(6.0 / (d_token + d_token))
            else:
                # PyTorch nn.Linear default: kaiming_uniform(a=sqrt(5)) ->
                # U(-1/sqrt(fan_in), 1/sqrt(fan_in)), fan_in = d_token.
                limit = 1.0 / math.sqrt(d_token)
            # Stored pre-transposed as (D_in, D_out): the kernel does x @ W.
            return jax.random.uniform(
                k, (d_token, d_token), jnp.float32, minval=-limit, maxval=limit
            )

        self.W_q = init_weight(keys[0], True)
        self.W_k = init_weight(keys[1], True)
        self.W_v = init_weight(keys[2], has_out)
        self.b_q = jnp.zeros((d_token,), jnp.float32)
        self.b_k = jnp.zeros((d_token,), jnp.float32)
        self.b_v = jnp.zeros((d_token,), jnp.float32)
        if has_out:
            self.W_out = init_weight(keys[3], False)
            self.b_out = jnp.zeros((d_token,), jnp.float32)
        else:
            self.W_out = None
            self.b_out = None

        # Fused K/V projection weight: x_kv is read once, MXU N-dim is 2x wider.
        self.W_kv = jnp.concatenate([self.W_k, self.W_v], axis=1)   # (D, 2D)
        self.b_kv = jnp.concatenate([self.b_k, self.b_v], axis=0)   # (2D,)

    def __call__(self, x_q, x_kv, key_compression=None, value_compression=None):
        assert (key_compression is None) == (value_compression is None)
        # TODO(synk): Linformer key/value compression path not implemented.
        b, nq, d = x_q.shape
        _, nkv, _ = x_kv.shape
        assert d == self.d_token

        d_head = d // self.n_heads
        scale = 1.0 / math.sqrt(d_head)
        has_out = self.W_out is not None
        use_bias = self.use_bias

        kernel = _make_mha_kernel(self.n_heads, d_head, scale, use_bias, has_out)

        args = [x_q, x_kv, self.W_q, self.W_kv]
        in_specs = [
            pl.BlockSpec((1, nq, d), lambda i: (i, 0, 0)),
            pl.BlockSpec((1, nkv, d), lambda i: (i, 0, 0)),
            pl.BlockSpec((d, d), lambda i: (0, 0)),          # resident weight
            pl.BlockSpec((d, 2 * d), lambda i: (0, 0)),      # resident weight
        ]
        if use_bias:
            args += [self.b_q.reshape(1, d), self.b_kv.reshape(1, 2 * d)]
            in_specs += [
                pl.BlockSpec((1, d), lambda i: (0, 0)),
                pl.BlockSpec((1, 2 * d), lambda i: (0, 0)),
            ]
        if has_out:
            args.append(self.W_out)
            in_specs.append(pl.BlockSpec((d, d), lambda i: (0, 0)))
            if use_bias:
                args.append(self.b_out.reshape(1, d))
                in_specs.append(pl.BlockSpec((1, d), lambda i: (0, 0)))

        return pl.pallas_call(
            kernel,
            out_shape=jax.ShapeDtypeStruct((b, nq, d), x_q.dtype),
            grid=(b,),
            in_specs=in_specs,
            out_specs=pl.BlockSpec((1, nq, d), lambda i: (i, 0, 0)),
            compiler_params=pltpu.CompilerParams(
                dimension_semantics=("parallel",)),
        )(*args)


# ----------------------------------------------------------------------------
# Pure-JAX reference for a correctness check
# ----------------------------------------------------------------------------
def reference_forward(mod, x_q, x_kv):
    q = x_q @ mod.W_q + mod.b_q
    k = x_kv @ mod.W_k + mod.b_k
    v = x_kv @ mod.W_v + mod.b_v
    b, nq, d = q.shape
    h = mod.n_heads
    dh = d // h

    def split(t):
        bb, nn, _ = t.shape
        return jnp.transpose(t.reshape(bb, nn, h, dh), (0, 2, 1, 3)).reshape(bb * h, nn, dh)

    qh, kh, vh = split(q), split(k), split(v)
    logits = jnp.einsum("bqd,bkd->bqk", qh, kh) / math.sqrt(dh)
    probs = jax.nn.softmax(logits, axis=-1)
    xh = jnp.einsum("bqk,bkd->bqd", probs, vh)
    x = jnp.transpose(xh.reshape(b, h, nq, dh), (0, 2, 1, 3)).reshape(b, nq, d)
    if mod.W_out is not None:
        x = x @ mod.W_out + mod.b_out
    return x


if __name__ == "__main__":
    key = jax.random.PRNGKey(0)
    k_params, k_xq, k_xkv = jax.random.split(key, 3)

    batch, seq, d_token, n_heads = 2, 8, 32, 4
    module = MultiheadAttentionPallas(
        d_token=d_token,
        n_heads=n_heads,
        dropout=0.0,
        bias=True,
        initialization="kaiming",
        key=k_params,
    )

    x_q = jax.random.normal(k_xq, (batch, seq, d_token), jnp.float32)
    x_kv = jax.random.normal(k_xkv, (batch, seq, d_token), jnp.float32)

    out = module(x_q, x_kv, None, None)
    out = jax.block_until_ready(out)

    ref = reference_forward(module, x_q, x_kv)
    assert out.shape == (batch, seq, d_token)
    # Tolerance loosened vs. 1e-5 because the softmax denominator uses the
    # EUP approximate reciprocal (pl.reciprocal(approx=True)).
    assert jnp.allclose(out, ref, atol=5e-3, rtol=5e-3), float(
        jnp.max(jnp.abs(out - ref))
    )

    print("KERNEL_OK")
</pallas_src>

<mosaic_0001>
module attributes {stable_mosaic.version = 11 : i64} {
  func.func @kernel(%arg0: i32, %arg1: memref<1x8x32xf32, #tpu.memory_space<vmem>>, %arg2: memref<1x8x32xf32, #tpu.memory_space<vmem>>, %arg3: memref<32x32xf32, #tpu.memory_space<vmem>>, %arg4: memref<32x64xf32, #tpu.memory_space<vmem>>, %arg5: memref<1x32xf32, #tpu.memory_space<vmem>>, %arg6: memref<1x64xf32, #tpu.memory_space<vmem>>, %arg7: memref<32x32xf32, #tpu.memory_space<vmem>>, %arg8: memref<1x32xf32, #tpu.memory_space<vmem>>, %arg9: memref<1x8x32xf32, #tpu.memory_space<vmem>>) attributes {dimension_semantics = [#tpu.dimension_semantics<parallel>], iteration_bounds = array<i64: 2>, scalar_prefetch = 0 : i64, scratch_operands = 0 : i64, tpu.core_type = #tpu.core_type<tc>, window_params = [{transform_indices = @transform_0, window_bounds = array<i64: 1, 8, 32>}, {transform_indices = @transform_1, window_bounds = array<i64: 1, 8, 32>}, {pipeline_mode = #tpu.pipeline_mode<synchronous>, transform_indices = @transform_2, window_bounds = array<i64: 32, 32>}, {pipeline_mode = #tpu.pipeline_mode<synchronous>, transform_indices = @transform_3, window_bounds = array<i64: 32, 64>}, {pipeline_mode = #tpu.pipeline_mode<synchronous>, transform_indices = @transform_4, window_bounds = array<i64: 1, 32>}, {pipeline_mode = #tpu.pipeline_mode<synchronous>, transform_indices = @transform_5, window_bounds = array<i64: 1, 64>}, {pipeline_mode = #tpu.pipeline_mode<synchronous>, transform_indices = @transform_6, window_bounds = array<i64: 32, 32>}, {pipeline_mode = #tpu.pipeline_mode<synchronous>, transform_indices = @transform_7, window_bounds = array<i64: 1, 32>}, {transform_indices = @transform_8, window_bounds = array<i64: 1, 8, 32>}]} {
    %c0 = arith.constant 0 : index
    %c0_0 = arith.constant 0 : index
    %c0_1 = arith.constant 0 : index
    %0 = vector.load %arg1[%c0, %c0_0, %c0_1] : memref<1x8x32xf32, #tpu.memory_space<vmem>>, vector<1x8x32xf32>
    %1 = vector.shape_cast %0 : vector<1x8x32xf32> to vector<8x32xf32>
    %c0_2 = arith.constant 0 : index
    %c0_3 = arith.constant 0 : index
    %c0_4 = arith.constant 0 : index
    %2 = vector.load %arg2[%c0_2, %c0_3, %c0_4] : memref<1x8x32xf32, #tpu.memory_space<vmem>>, vector<1x8x32xf32>
    %3 = vector.shape_cast %2 : vector<1x8x32xf32> to vector<8x32xf32>
    %c0_5 = arith.constant 0 : index
    %c0_6 = arith.constant 0 : index
    %4 = vector.load %arg3[%c0_5, %c0_6] : memref<32x32xf32, #tpu.memory_space<vmem>>, vector<32x32xf32>
    %cst = arith.constant dense<0.000000e+00> : vector<8x32xf32>
    %5 = tpu.matmul %1, %4, %cst {dimension_numbers = #tpu.dot_dimension_numbers<[1], [0], [0], [1], [0, 0, 1, 1], [], []>} : vector<8x32xf32>, vector<32x32xf32>, vector<8x32xf32> -> vector<8x32xf32>
    %c0_7 = arith.constant 0 : index
    %c0_8 = arith.constant 0 : index
    %6 = vector.load %arg4[%c0_7, %c0_8] : memref<32x64xf32, #tpu.memory_space<vmem>>, vector<32x64xf32>
    %cst_9 = arith.constant dense<0.000000e+00> : vector<8x64xf32>
    %7 = tpu.matmul %3, %6, %cst_9 {dimension_numbers = #tpu.dot_dimension_numbers<[1], [0], [0], [1], [0, 0, 1, 1], [], []>} : vector<8x32xf32>, vector<32x64xf32>, vector<8x64xf32> -> vector<8x64xf32>
    %c0_10 = arith.constant 0 : index
    %c0_11 = arith.constant 0 : index
    %8 = vector.load %arg5[%c0_10, %c0_11] : memref<1x32xf32, #tpu.memory_space<vmem>>, vector<1x32xf32>
    %9 = vector.broadcast %8 : vector<1x32xf32> to vector<8x32xf32>
    %10 = arith.addf %5, %9 : vector<8x32xf32>
    %c0_12 = arith.constant 0 : index
    %c0_13 = arith.constant 0 : index
    %11 = vector.load %arg6[%c0_12, %c0_13] : memref<1x64xf32, #tpu.memory_space<vmem>>, vector<1x64xf32>
    %12 = vector.broadcast %11 : vector<1x64xf32> to vector<8x64xf32>
    %13 = arith.addf %7, %12 : vector<8x64xf32>
    %cst_14 = arith.constant 0.353553385 : f32
    %14 = vector.broadcast %cst_14 : f32 to vector<8x32xf32>
    %15 = arith.mulf %10, %14 : vector<8x32xf32>
    %16 = vector.extract_strided_slice %13 {offsets = [0, 0], sizes = [8, 32], strides = [1, 1]} : vector<8x64xf32> to vector<8x32xf32>
    %17 = vector.extract_strided_slice %13 {offsets = [0, 32], sizes = [8, 32], strides = [1, 1]} : vector<8x64xf32> to vector<8x32xf32>
    %18 = vector.extract_strided_slice %15 {offsets = [0, 0], sizes = [8, 8], strides = [1, 1]} : vector<8x32xf32> to vector<8x8xf32>
    %19 = vector.extract_strided_slice %16 {offsets = [0, 0], sizes = [8, 8], strides = [1, 1]} : vector<8x32xf32> to vector<8x8xf32>
    %20 = vector.extract_strided_slice %17 {offsets = [0, 0], sizes = [8, 8], strides = [1, 1]} : vector<8x32xf32> to vector<8x8xf32>
    %cst_15 = arith.constant dense<0.000000e+00> : vector<8x8xf32>
    %21 = tpu.matmul %18, %19, %cst_15 {dimension_numbers = #tpu.dot_dimension_numbers<[1], [1], [0], [0], [0, 0, 1, 0], [], []>} : vector<8x8xf32>, vector<8x8xf32>, vector<8x8xf32> -> vector<8x8xf32>
    %cst_16 = arith.constant dense<0xFF800000> : vector<8xf32>
    %22 = vector.multi_reduction <maximumf>, %21, %cst_16 [1] : vector<8x8xf32> to vector<8xf32>
    %23 = vector.shape_cast %22 : vector<8xf32> to vector<8x1xf32>
    %24 = vector.broadcast %23 : vector<8x1xf32> to vector<8x8xf32>
    %25 = arith.subf %21, %24 : vector<8x8xf32>
    %26 = math.exp %25 : vector<8x8xf32>
    %cst_17 = arith.constant dense<0.000000e+00> : vector<8xf32>
    %27 = vector.multi_reduction <add>, %26, %cst_17 [1] : vector<8x8xf32> to vector<8xf32>
    %28 = vector.shape_cast %27 : vector<8xf32> to vector<8x1xf32>
    %29 = tpu.reciprocal %28 {approx = true} : vector<8x1xf32> -> vector<8x1xf32>
    %30 = vector.broadcast %29 : vector<8x1xf32> to vector<8x8xf32>
    %31 = arith.mulf %26, %30 : vector<8x8xf32>
    %cst_18 = arith.constant dense<0.000000e+00> : vector<8x8xf32>
    %32 = tpu.matmul %31, %20, %cst_18 {dimension_numbers = #tpu.dot_dimension_numbers<[1], [0], [0], [1], [0, 0, 1, 1], [], []>} : vector<8x8xf32>, vector<8x8xf32>, vector<8x8xf32> -> vector<8x8xf32>
    %c0_19 = arith.constant 0 : index
    %c0_20 = arith.constant 0 : index
    %33 = vector.load %arg7[%c0_19, %c0_20] : memref<32x32xf32, #tpu.memory_space<vmem>>, vector<8x32xf32>
    %cst_21 = arith.constant dense<0.000000e+00> : vector<8x32xf32>
    %34 = tpu.matmul %32, %33, %cst_21 {dimension_numbers = #tpu.dot_dimension_numbers<[1], [0], [0], [1], [0, 0, 1, 1], [], []>} : vector<8x8xf32>, vector<8x32xf32>, vector<8x32xf32> -> vector<8x32xf32>
    %35 = vector.extract_strided_slice %15 {offsets = [0, 8], sizes = [8, 8], strides = [1, 1]} : vector<8x32xf32> to vector<8x8xf32>
    %36 = vector.extract_strided_slice %16 {offsets = [0, 8], sizes = [8, 8], strides = [1, 1]} : vector<8x32xf32> to vector<8x8xf32>
    %37 = vector.extract_strided_slice %17 {offsets = [0, 8], sizes = [8, 8], strides = [1, 1]} : vector<8x32xf32> to vector<8x8xf32>
    %cst_22 = arith.constant dense<0.000000e+00> : vector<8x8xf32>
    %38 = tpu.matmul %35, %36, %cst_22 {dimension_numbers = #tpu.dot_dimension_numbers<[1], [1], [0], [0], [0, 0, 1, 0], [], []>} : vector<8x8xf32>, vector<8x8xf32>, vector<8x8xf32> -> vector<8x8xf32>
    %cst_23 = arith.constant dense<0xFF800000> : vector<8xf32>
    %39 = vector.multi_reduction <maximumf>, %38, %cst_23 [1] : vector<8x8xf32> to vector<8xf32>
    %40 = vector.shape_cast %39 : vector<8xf32> to vector<8x1xf32>
    %41 = vector.broadcast %40 : vector<8x1xf32> to vector<8x8xf32>
    %42 = arith.subf %38, %41 : vector<8x8xf32>
    %43 = math.exp %42 : vector<8x8xf32>
    %cst_24 = arith.constant dense<0.000000e+00> : vector<8xf32>
    %44 = vector.multi_reduction <add>, %43, %cst_24 [1] : vector<8x8xf32> to vector<8xf32>
    %45 = vector.shape_cast %44 : vector<8xf32> to vector<8x1xf32>
    %46 = tpu.reciprocal %45 {approx = true} : vector<8x1xf32> -> vector<8x1xf32>
    %47 = vector.broadcast %46 : vector<8x1xf32> to vector<8x8xf32>
    %48 = arith.mulf %43, %47 : vector<8x8xf32>
    %cst_25 = arith.constant dense<0.000000e+00> : vector<8x8xf32>
    %49 = tpu.matmul %48, %37, %cst_25 {dimension_numbers = #tpu.dot_dimension_numbers<[1], [0], [0], [1], [0, 0, 1, 1], [], []>} : vector<8x8xf32>, vector<8x8xf32>, vector<8x8xf32> -> vector<8x8xf32>
    %c8 = arith.constant 8 : index
    %c0_26 = arith.constant 0 : index
    %50 = vector.load %arg7[%c8, %c0_26] : memref<32x32xf32, #tpu.memory_space<vmem>>, vector<8x32xf32>
    %cst_27 = arith.constant dense<0.000000e+00> : vector<8x32xf32>
    %51 = tpu.matmul %49, %50, %cst_27 {dimension_numbers = #tpu.dot_dimension_numbers<[1], [0], [0], [1], [0, 0, 1, 1], [], []>} : vector<8x8xf32>, vector<8x32xf32>, vector<8x32xf32> -> vector<8x32xf32>
    %52 = arith.addf %34, %51 : vector<8x32xf32>
    %53 = vector.extract_strided_slice %15 {offsets = [0, 16], sizes = [8, 8], strides = [1, 1]} : vector<8x32xf32> to vector<8x8xf32>
    %54 = vector.extract_strided_slice %16 {offsets = [0, 16], sizes = [8, 8], strides = [1, 1]} : vector<8x32xf32> to vector<8x8xf32>
    %55 = vector.extract_strided_slice %17 {offsets = [0, 16], sizes = [8, 8], strides = [1, 1]} : vector<8x32xf32> to vector<8x8xf32>
    %cst_28 = arith.constant dense<0.000000e+00> : vector<8x8xf32>
    %56 = tpu.matmul %53, %54, %cst_28 {dimension_numbers = #tpu.dot_dimension_numbers<[1], [1], [0], [0], [0, 0, 1, 0], [], []>} : vector<8x8xf32>, vector<8x8xf32>, vector<8x8xf32> -> vector<8x8xf32>
    %cst_29 = arith.constant dense<0xFF800000> : vector<8xf32>
    %57 = vector.multi_reduction <maximumf>, %56, %cst_29 [1] : vector<8x8xf32> to vector<8xf32>
    %58 = vector.shape_cast %57 : vector<8xf32> to vector<8x1xf32>
    %59 = vector.broadcast %58 : vector<8x1xf32> to vector<8x8xf32>
    %60 = arith.subf %56, %59 : vector<8x8xf32>
    %61 = math.exp %60 : vector<8x8xf32>
    %cst_30 = arith.constant dense<0.000000e+00> : vector<8xf32>
    %62 = vector.multi_reduction <add>, %61, %cst_30 [1] : vector<8x8xf32> to vector<8xf32>
    %63 = vector.shape_cast %62 : vector<8xf32> to vector<8x1xf32>
    %64 = tpu.reciprocal %63 {approx = true} : vector<8x1xf32> -> vector<8x1xf32>
    %65 = vector.broadcast %64 : vector<8x1xf32> to vector<8x8xf32>
    %66 = arith.mulf %61, %65 : vector<8x8xf32>
    %cst_31 = arith.constant dense<0.000000e+00> : vector<8x8xf32>
    %67 = tpu.matmul %66, %55, %cst_31 {dimension_numbers = #tpu.dot_dimension_numbers<[1], [0], [0], [1], [0, 0, 1, 1], [], []>} : vector<8x8xf32>, vector<8x8xf32>, vector<8x8xf32> -> vector<8x8xf32>
    %c16 = arith.constant 16 : index
    %c0_32 = arith.constant 0 : index
    %68 = vector.load %arg7[%c16, %c0_32] : memref<32x32xf32, #tpu.memory_space<vmem>>, vector<8x32xf32>
    %cst_33 = arith.constant dense<0.000000e+00> : vector<8x32xf32>
    %69 = tpu.matmul %67, %68, %cst_33 {dimension_numbers = #tpu.dot_dimension_numbers<[1], [0], [0], [1], [0, 0, 1, 1], [], []>} : vector<8x8xf32>, vector<8x32xf32>, vector<8x32xf32> -> vector<8x32xf32>
    %70 = arith.addf %52, %69 : vector<8x32xf32>
    %71 = vector.extract_strided_slice %15 {offsets = [0, 24], sizes = [8, 8], strides = [1, 1]} : vector<8x32xf32> to vector<8x8xf32>
    %72 = vector.extract_strided_slice %16 {offsets = [0, 24], sizes = [8, 8], strides = [1, 1]} : vector<8x32xf32> to vector<8x8xf32>
    %73 = vector.extract_strided_slice %17 {offsets = [0, 24], sizes = [8, 8], strides = [1, 1]} : vector<8x32xf32> to vector<8x8xf32>
    %cst_34 = arith.constant dense<0.000000e+00> : vector<8x8xf32>
    %74 = tpu.matmul %71, %72, %cst_34 {dimension_numbers = #tpu.dot_dimension_numbers<[1], [1], [0], [0], [0, 0, 1, 0], [], []>} : vector<8x8xf32>, vector<8x8xf32>, vector<8x8xf32> -> vector<8x8xf32>
    %cst_35 = arith.constant dense<0xFF800000> : vector<8xf32>
    %75 = vector.multi_reduction <maximumf>, %74, %cst_35 [1] : vector<8x8xf32> to vector<8xf32>
    %76 = vector.shape_cast %75 : vector<8xf32> to vector<8x1xf32>
    %77 = vector.broadcast %76 : vector<8x1xf32> to vector<8x8xf32>
    %78 = arith.subf %74, %77 : vector<8x8xf32>
    %79 = math.exp %78 : vector<8x8xf32>
    %cst_36 = arith.constant dense<0.000000e+00> : vector<8xf32>
    %80 = vector.multi_reduction <add>, %79, %cst_36 [1] : vector<8x8xf32> to vector<8xf32>
    %81 = vector.shape_cast %80 : vector<8xf32> to vector<8x1xf32>
    %82 = tpu.reciprocal %81 {approx = true} : vector<8x1xf32> -> vector<8x1xf32>
    %83 = vector.broadcast %82 : vector<8x1xf32> to vector<8x8xf32>
    %84 = arith.mulf %79, %83 : vector<8x8xf32>
    %cst_37 = arith.constant dense<0.000000e+00> : vector<8x8xf32>
    %85 = tpu.matmul %84, %73, %cst_37 {dimension_numbers = #tpu.dot_dimension_numbers<[1], [0], [0], [1], [0, 0, 1, 1], [], []>} : vector<8x8xf32>, vector<8x8xf32>, vector<8x8xf32> -> vector<8x8xf32>
    %c24 = arith.constant 24 : index
    %c0_38 = arith.constant 0 : index
    %86 = vector.load %arg7[%c24, %c0_38] : memref<32x32xf32, #tpu.memory_space<vmem>>, vector<8x32xf32>
    %cst_39 = arith.constant dense<0.000000e+00> : vector<8x32xf32>
    %87 = tpu.matmul %85, %86, %cst_39 {dimension_numbers = #tpu.dot_dimension_numbers<[1], [0], [0], [1], [0, 0, 1, 1], [], []>} : vector<8x8xf32>, vector<8x32xf32>, vector<8x32xf32> -> vector<8x32xf32>
    %88 = arith.addf %70, %87 : vector<8x32xf32>
    %c0_40 = arith.constant 0 : index
    %c0_41 = arith.constant 0 : index
    %89 = vector.load %arg8[%c0_40, %c0_41] : memref<1x32xf32, #tpu.memory_space<vmem>>, vector<1x32xf32>
    %90 = vector.broadcast %89 : vector<1x32xf32> to vector<8x32xf32>
    %91 = arith.addf %88, %90 : vector<8x32xf32>
    %c0_42 = arith.constant 0 : index
    %c0_43 = arith.constant 0 : index
    %c0_44 = arith.constant 0 : index
    %92 = vector.load %arg9[%c0_42, %c0_43, %c0_44] : memref<1x8x32xf32, #tpu.memory_space<vmem>>, vector<1x8x32xf32>
    %93 = vector.shape_cast %92 : vector<1x8x32xf32> to vector<8x32xf32>
    %94 = vector.shape_cast %91 : vector<8x32xf32> to vector<1x8x32xf32>
    tpu.vector_store %arg9[%c0_42, %c0_43, %c0_44], %94 {strides = array<i32>} : memref<1x8x32xf32, #tpu.memory_space<vmem>>, vector<1x8x32xf32>,
    return
  }
  func.func @transform_0(%arg0: i32) -> (i32, i32, i32) {
    %c0_i32 = arith.constant 0 : i32
    %c0_i32_0 = arith.constant 0 : i32
    %c0_i32_1 = arith.constant 0 : i32
    return %arg0, %c0_i32, %c0_i32_0 : i32, i32, i32
  }
  func.func @transform_1(%arg0: i32) -> (i32, i32, i32) {
    %c0_i32 = arith.constant 0 : i32
    %c0_i32_0 = arith.constant 0 : i32
    %c0_i32_1 = arith.constant 0 : i32
    return %arg0, %c0_i32, %c0_i32_0 : i32, i32, i32
  }
  func.func @transform_2(%arg0: i32) -> (i32, i32) {
    %c0_i32 = arith.constant 0 : i32
    %c0_i32_0 = arith.constant 0 : i32
    %c0_i32_1 = arith.constant 0 : i32
    return %c0_i32, %c0_i32_0 : i32, i32
  }
  func.func @transform_3(%arg0: i32) -> (i32, i32) {
    %c0_i32 = arith.constant 0 : i32
    %c0_i32_0 = arith.constant 0 : i32
    %c0_i32_1 = arith.constant 0 : i32
    return %c0_i32, %c0_i32_0 : i32, i32
  }
  func.func @transform_4(%arg0: i32) -> (i32, i32) {
    %c0_i32 = arith.constant 0 : i32
    %c0_i32_0 = arith.constant 0 : i32
    %c0_i32_1 = arith.constant 0 : i32
    return %c0_i32, %c0_i32_0 : i32, i32
  }
  func.func @transform_5(%arg0: i32) -> (i32, i32) {
    %c0_i32 = arith.constant 0 : i32
    %c0_i32_0 = arith.constant 0 : i32
    %c0_i32_1 = arith.constant 0 : i32
    return %c0_i32, %c0_i32_0 : i32, i32
  }
  func.func @transform_6(%arg0: i32) -> (i32, i32) {
    %c0_i32 = arith.constant 0 : i32
    %c0_i32_0 = arith.constant 0 : i32
    %c0_i32_1 = arith.constant 0 : i32
    return %c0_i32, %c0_i32_0 : i32, i32
  }
  func.func @transform_7(%arg0: i32) -> (i32, i32) {
    %c0_i32 = arith.constant 0 : i32
    %c0_i32_0 = arith.constant 0 : i32
    %c0_i32_1 = arith.constant 0 : i32
    return %c0_i32, %c0_i32_0 : i32, i32
  }
  func.func @transform_8(%arg0: i32) -> (i32, i32, i32) {
    %c0_i32 = arith.constant 0 : i32
    %c0_i32_0 = arith.constant 0 : i32
    %c0_i32_1 = arith.constant 0 : i32
    return %arg0, %c0_i32, %c0_i32_0 : i32, i32, i32
  }
}

</mosaic_0001>

<bundles_post_ra>
// kernel: tpu_custom_call.1
= control target key start
LH: loop header
LB: loop body
LE: loop exit
PB: predicated region body
PF: predicated region fallthrough
CT: control target
= control target key end

     0   :  { %s2540_s0 = inlined_call_operand.hbm [shape: f32[2,8,32], index: 0, kind: input, shape index: {}]   ;;  %s2541_s1 = inlined_call_operand.hbm [shape: f32[2,8,32], index: 1, kind: input, shape index: {}]   ;;  %s2542_s2 = inlined_call_operand.hbm [shape: f32[32,32], index: 2, kind: input, shape index: {}]   ;;  %s2543_s3 = inlined_call_operand.hbm [shape: f32[32,64], index: 3, kind: input, shape index: {}]   ;;  %s2544_s4 = inlined_call_operand.vmem [shape: f32[1,32], index: 4, kind: input, shape index: {}]   ;;  %s2545_s5 = inlined_call_operand.vmem [shape: f32[1,64], index: 5, kind: input, shape index: {}]   ;;  %s2546_s6 = inlined_call_operand.hbm [shape: f32[32,32], index: 6, kind: input, shape index: {}]   ;;  %s2547_s7 = inlined_call_operand.vmem [shape: f32[1,32], index: 7, kind: input, shape index: {}]   ;;  %s2548_s8 = inlined_call_operand.hbm [shape: f32[2,8,32], index: 8, kind: output, shape index: {}]  }
   0x1   :  { %2554 = sst [smem:[#allocation19_spill]] %s2542_s2 }
   0x2   :  { %2555 = sst [smem:[#allocation20_spill]] %s2543_s3 }
   0x3   :  { %2556 = sst [smem:[#allocation21_spill]] %s2546_s6 }
   0x4   :  { %13 = vsyncpa [#allocation3], 0 }
   0x5   :  { %15 = vsyncpa [#allocation3 + $0x1], 0 }
   0x6   :  { %16 = vsyncpa [#allocation6], 0 }
   0x7   :  { %18 = vsyncpa [#allocation6 + $0x1], 0 }
   0x8   :  { %19 = vsyncpa [#allocation9], 0 }
   0x9   :  { %20 = vsyncpa [#allocation4], 0 }
   0xa   :  { %22 = vsyncpa [#allocation4 + $0x1], 0  ;;  %s2215_s27 = smov 0   ;;  %s2217_s28 = smov 0  }
   0xb   :  { %s2219_s29 = smov 0   ;;  %s2221_s30 = smov 0  }
   0xc LB: > { %2557 = sst [smem:[#allocation17_spill]] %s2147_s29  ;;  %s2236_s9 = sadd.s32 4294967295, %s2151_s30   ;;  %s2151_s30 = sphi %s2221_s30, %s2582_s30   ;;  %s2147_s29 = sphi %s2219_s29, %s2579_s29   ;;  %s2143_s28 = sphi %s2217_s28, %s2581_s28   ;;  %s2139_s27 = sphi %s2215_s27, %s2580_s27  }
   0xd   : > { %s1674_s10 = sadd.s32 4294967294, %s2151_s30   ;;  %p48_p0 = scmp.ne.s32.totalorder %s2143_s28, %s2139_s27 }
   0xe   : > { %p2549_p1 = scmp.eq.s32.totalorder %s2236_s9, 0  ;;  %p230_p3 = scmp.eq.s32.totalorder %s1674_s10, 1 }
   0xf   : > { %p1675_p5 = scmp.ge.s32.totalorder %s2151_s30, 1  ;;  %p237_p7 = scmp.lt.s32.totalorder %s2151_s30, 3 }
  0x10   : > { %p2245_p4 = por %p2549_p1, %p48_p0  ;;  %p2250_p6 = por %p230_p3, %p48_p0 }
  0x11   : > { %p2255_p8 = pnand %p1675_p5, %p237_p7  ;;  %s2153_s14 = smov [#allocation7]  }
  0x12   : > { %s2558_s11 = scalar_select %p2245_p4, 1, 0 }
  0x13   : > { %s2559_s12 = scalar_select %p2250_p6, 1, 0 }
  0x14   : > { %s2560_s13 = scalar_select %p2255_p8, 1, 0 }
  0x15   : > { %s249_s15 = sshll.u32 %s2153_s14, 4  ;;  %p1850_p9 = pneg %p2255_p8  ;;  %s250_s15 = int_to_ptr.vmem [resolvable:$true] %s249_s15 }
  0x16   : > { %s2154_s17 = smov [#allocation8]   ;;  %s2155_s19 = smov [#allocation10]  }
  0x17   : > { %p2264_p11 = pnand %p1850_p9, %p2549_p1  ;;  %s262_s18 = sshll.u32 %s2154_s17, 4  ;;  %s263_s18 = int_to_ptr.vmem [resolvable:$true] %s262_s18 }
  0x18   : > { %s281_s20 = sshll.u32 %s2155_s19, 4  ;;  %s1952_s21 = scalar_lea.vmem %s250_s15, 512  ;;  %s282_s20 = int_to_ptr.vmem [resolvable:$true] %s281_s20 }
  0x19   : > { %p1943_p12 = pneg %p2264_p11  ;;  %p1953_p13 = scmp.ne.s32.totalorder %s250_s15, %s1952_s21 }
  0x1a   : > { %p1960_p5 = scmp.lt.s32.totalorder %s250_s15, %s250_s15  ;;  %p1961_p7 = scmp.lt.s32.totalorder %s1952_s21, %s1952_s21 }
  0x1b   : > { %p1955_p0 = pnand %p1953_p13, %p1943_p12 }
  0x1c   : > { %p1962_p9 = por %p1961_p7, %p1960_p5 }
  0x1d   : > { %p1956_p3 = pneg %p1955_p0 }
  0x1f   : > { %p1963_p10 = pnand %p1962_p9, %p1956_p3 }
  0x21   : > { %1966 = shalt.err (!%p1963_p10)
}
  0x22   : > { %s2156_s22 = smov 128   ;;  %s2157_s23 = smov 8  }
  0x23   : > { %s2562_s2 = sld [smem:[#allocation19_spill]]  ;;  %s1978_s26 = scalar_lea.vmem %s263_s18, 512 }
  0x24   : > { %p1979_p1 = scmp.ne.s32.totalorder %s263_s18, %s1978_s26  ;;  %p1986_p2 = scmp.lt.s32.totalorder %s263_s18, %s263_s18 }
  0x25   : > { %p1987_p6 = scmp.lt.s32.totalorder %s1978_s26, %s1978_s26 }
  0x26   : > { %p1981_p13 = pnand %p1979_p1, %p1943_p12 }
  0x27   : > { %p1988_p5 = por %p1987_p6, %p1986_p2 }
  0x28   : > { %p1982_p0 = pneg %p1981_p13 }
  0x29   : > { %1853 = dma.hbm_to_vmem [thread:$0]  (!%p2264_p11), %s2562_s2, 512, %s250_s15, [#allocation6], %s2156_s22, %s2156_s22, %s2157_s23  }
  0x2a   : > { %p1989_p3 = pnand %p1988_p5, %p1982_p0 }
  0x2c   : > { %1992 = shalt.err (!%p1989_p3)
}
  0x2d   : > { %s2563_s3 = sld [smem:[#allocation20_spill]]  ;;  %s2004_s15 = scalar_lea.vmem %s282_s20, 512 }
  0x2e   : > { %p2005_p10 = scmp.ne.s32.totalorder %s282_s20, %s2004_s15  ;;  %p2012_p9 = scmp.lt.s32.totalorder %s282_s20, %s282_s20 }
  0x2f   : > { %p2013_p13 = scmp.lt.s32.totalorder %s2004_s15, %s2004_s15 }
  0x30   : > { %p2007_p7 = pnand %p2005_p10, %p1943_p12 }
  0x31   : > { %p2014_p4 = por %p2013_p13, %p2012_p9 }
  0x32   : > { %p2008_p1 = pneg %p2007_p7 }
  0x33   : > { %1856 = dma.hbm_to_vmem [thread:$0]  (!%p2264_p11), %s2563_s3, 512, %s263_s18, [#allocation9], %s2156_s22, %s2156_s22, %s2157_s23  }
  0x34   : > { %p2015_p2 = pnand %p2014_p4, %p2008_p1 }
  0x36   : > { %2018 = shalt.err (!%p2015_p2)
}
  0x37   : > { %s2564_s6 = sld [smem:[#allocation21_spill]]  ;;  %s2295_s18 = sadd.s32 1, %s2151_s30  }
  0x38   : > { %s32_s21 = ssub.s32 %s2151_s30, %s2295_s18  ;;  %s35_s16 = sadd.s32 1, %s2147_s29 }
  0x39   : > { %p33_p4 = scmp.eq.s32.totalorder %s32_s21, 0  ;;  %p42_p6 = scmp.ne.s32.totalorder %s2147_s29, %s2143_s28 }
  0x3a   : > { %p43_p12 = scmp.eq.s32.totalorder %s2151_s30, 0  ;;  %p1874_p0 = scmp.lt.s32.totalorder %s2151_s30, 2 }
  0x3b   : > { %s2305_s24 = scalar_select %p33_p4, %s2147_s29, %s35_s16  }
  0x3c   : > { %p44_p5 = por %p43_p12, %p42_p6  ;;  %p2566_p3 = scmp.eq.s32.totalorder %s2236_s9, 1 }
  0x3d   : > { %1859 = dma.hbm_to_vmem [thread:$0]  (!%p2264_p11), %s2564_s6, 512, %s282_s20, [#allocation9], %s2156_s22, %s2156_s22, %s2157_s23  }
  0x3e   : > { %2565 = sst [smem:[#allocation18_spill]] %s2305_s24  ;;  %p2309_p10 = por %p2566_p3, %p42_p6 }
  0x3f   : > { %s298_s26 = sand.u32 1, %s2147_s29   ;;  %s1681_s10 = sshll.u32 %s2151_s30, 7 }
  0x40   : > { %s2567_s25 = scalar_select %p2309_p10, 1, 0 }
  0x41   : > { %s2315_s20 = sshll.u32 %s298_s26, 3  ;;  %s2320_s14 = scalar_lea.hbm %s2540_s0, %s1681_s10 }
  0x42   : > { %s302_s15 = scalar_lea.vmem [#allocation2], %s2315_s20  ;;  %p2323_p11 = pnand %p1874_p0, %p44_p5 }
  0x43   : > { %s309_s17 = sshll.u32 %s302_s15, 4  ;;  %s2330_s2 = scalar_lea.hbm %s2541_s1, %s1681_s10  ;;  %s310_s17 = int_to_ptr.vmem [resolvable:$true] %s309_s17 }
  0x44   : > { %s299_s22 = scalar_lea.sflag [#allocation3], %s298_s26  ;;  %s2019_s23 = scalar_lea.hbm %s2320_s14, 128 }
  0x45   : > { %p2020_p7 = scmp.ne.s32.totalorder %s2320_s14, %s2019_s23  ;;  %p2021_p1 = pneg %p2323_p11 }
  0x46   : > { %s2024_s6 = scalar_lea.hbm %s2540_s0, 256  ;;  %p2025_p2 = scmp.lt.s32.totalorder %s2320_s14, %s2540_s0 }
  0x47   : > { %p2022_p9 = pnand %p2021_p1, %p2020_p7  ;;  %p2026_p4 = scmp.lt.s32.totalorder %s2024_s6, %s2019_s23 }
  0x49   : > { %p2023_p13 = pneg %p2022_p9  ;;  %p2027_p6 = por %p2026_p4, %p2025_p2 }
  0x4b   : > { %p2028_p12 = pnand %p2027_p6, %p2023_p13 }
  0x4d   : > { %2031 = shalt.err (!%p2028_p12)
}
  0x4e   : > { %s2032_s26 = scalar_lea.vmem %s310_s17, 128  ;;  %s2158_s10 = smov [#allocation2]  }
  0x4f   : > { %p2033_p0 = scmp.ne.s32.totalorder %s310_s17, %s2032_s26  ;;  %s2037_s21 = sshll.u32 %s2158_s10, 4  ;;  %s2038_s21 = int_to_ptr.vmem [resolvable:$false] %s2037_s21 }
  0x50   : > { %s2039_s3 = scalar_lea.vmem %s2038_s21, 256  ;;  %p2040_p7 = scmp.lt.s32.totalorder %s310_s17, %s2038_s21 }
  0x51   : > { %p2035_p5 = pnand %p2033_p0, %p2021_p1  ;;  %p2041_p9 = scmp.lt.s32.totalorder %s2039_s3, %s2032_s26 }
  0x53   : > { %p2036_p3 = pneg %p2035_p5  ;;  %p2042_p10 = por %p2041_p9, %p2040_p7 }
  0x55   : > { %p2043_p8 = pnand %p2042_p10, %p2036_p3 }
  0x57   : > { %2046 = shalt.err (!%p2043_p8)
}
  0x58   : > { %1863 = dma.hbm_to_vmem [thread:$0]  (!%p2323_p11), %s2320_s14, 128, %s310_s17, %s299_s22  }
  0x59   : > { %s316_s6 = sand.u32 1, %s2151_s30   ;;  %s320_s29 = scalar_lea.vmem [#allocation5], %s2315_s20 }
  0x5a   : > { %s327_s24 = sshll.u32 %s320_s29, 4  ;;  %s317_s16 = scalar_lea.sflag [#allocation6], %s316_s6  ;;  %s328_s24 = int_to_ptr.vmem [resolvable:$true] %s327_s24 }
  0x5b   : > { %s2047_s23 = scalar_lea.hbm %s2330_s2, 128  ;;  %s2052_s10 = scalar_lea.hbm %s2541_s1, 256 }
  0x5c   : > { %p2048_p13 = scmp.ne.s32.totalorder %s2330_s2, %s2047_s23  ;;  %p2053_p2 = scmp.lt.s32.totalorder %s2330_s2, %s2541_s1 }
  0x5d   : > { %p2054_p4 = scmp.lt.s32.totalorder %s2052_s10, %s2047_s23 }
  0x5e   : > { %p2050_p8 = pnand %p2048_p13, %p2021_p1 }
  0x5f   : > { %p2055_p6 = por %p2054_p4, %p2053_p2 }
  0x60   : > { %p2051_p10 = pneg %p2050_p8 }
  0x62   : > { %p2056_p12 = pnand %p2055_p6, %p2051_p10 }
  0x64   : > { %2059 = shalt.err (!%p2056_p12)
}
  0x65   : > { %s2060_s20 = scalar_lea.vmem %s328_s24, 128  ;;  %s2159_s14 = smov [#allocation5]  }
  0x66   : > { %p2061_p0 = scmp.ne.s32.totalorder %s328_s24, %s2060_s20  ;;  %s2065_s17 = sshll.u32 %s2159_s14, 4  ;;  %s2066_s17 = int_to_ptr.vmem [resolvable:$false] %s2065_s17 }
  0x67   : > { %s2067_s22 = scalar_lea.vmem %s2066_s17, 256  ;;  %p2068_p7 = scmp.lt.s32.totalorder %s328_s24, %s2066_s17 }
  0x68   : > { %p2063_p5 = pnand %p2061_p0, %p2021_p1  ;;  %p2069_p9 = scmp.lt.s32.totalorder %s2067_s22, %s2060_s20 }
  0x6a   : > { %p2064_p3 = pneg %p2063_p5  ;;  %p2070_p13 = por %p2069_p9, %p2068_p7 }
  0x6c   : > { %p2071_p8 = pnand %p2070_p13, %p2064_p3 }
  0x6e   : > { %2074 = shalt.err (!%p2071_p8)
}
  0x6f   : > { %1866 = dma.hbm_to_vmem [thread:$0]  (!%p2323_p11), %s2330_s2, 128, %s328_s24, %s317_s16  }
  0x70   : > { %p2569_p10 = scmp.ne.s32.totalorder %s2560_s13, 0 }
  0x71   : > { %s2375_s6 = sand.u32 (!%p2569_p10), 1, %s2143_s28   ;;  %p2570_p1 = scmp.ne.s32.totalorder (!%p2569_p10), %s2558_s11, 0 }
  0x72   : > { %336 = sbr.rel (%p2569_p10) target bundleno = 2573 (0xa0d), region = 52  ;;  %s2378_s29 = sshll.u32 (!%p2569_p10), %s2375_s6, 3 }
  0x73   : > { %s339_s23 = scalar_lea.sflag (!%p2569_p10), [#allocation3], %s2375_s6  ;;  %s342_s15 = scalar_lea.vmem (!%p2569_p10), [#allocation2], %s2378_s29 }
  0x77   : > { %2118 = dma.done.wait (%p2570_p1), %s339_s23, 128  }
  0x78   : > { %2120 = vsyncadd (%p2570_p1), %s339_s23, 4294967168  ;;  %s347_s2 = sand.u32 1, %s2236_s9   ;;  %s351_s19 = scalar_lea.vmem [#allocation5], %s2378_s29 }
  0x79   : > { %s348_s13 = scalar_lea.sflag [#allocation6], %s347_s2 }
  0x7a   : > { %2122 = dma.done.wait (%p2570_p1), %s348_s13, 128  }
  0x7b   : > { %2124 = vsyncadd (%p2570_p1), %s348_s13, 4294967168  ;;  %p2571_p11 = scmp.eq.s32.totalorder %s2236_s9, 0 }
  0x7d   : > { %2126 = dma.done.wait (%p2571_p11), [#allocation6], 512   ;;  %p2572_p2 = pmov %p2571_p11 }
  0x7f   : > { %2128 = vsyncadd (%p2572_p2), [#allocation6], 4294966784  ;;  %p2573_p4 = pmov %p2572_p2 }
  0x80   : > { %p2574_p6 = pmov %p2572_p2 }
  0x81   : > { %2130 = dma.done.wait (%p2573_p4), [#allocation9], 1024  }
  0x82   : > { %2132 = vsyncadd (%p2574_p6), [#allocation9], 4294966272  ;;  %v2160_v0 = vmov 0.0   ;;  %vm2161_vm0 = vmmov 0   ;;  %v406_v1 = vld [vmem:[#allocation7 + $0x18] sm:$0xff]  ;;  %v405_v3 = vld [vmem:[#allocation7 + $0x10] sm:$0xff] }
  0x83   : > { %1750 = vmatprep.subr.mxu0 %v2160_v0  ;;  %1761 = vmatprep.subr.mxu1 %v2160_v0  ;;  %v410_v2 = vld [vmem:[#allocation8 + $0x18] sm:$0xff]  ;;  %v409_v4 = vld [vmem:[#allocation8 + $0x10] sm:$0xff]  ;;  %v404_v5 = vld [vmem:[#allocation7 + $0x8] sm:$0xff]  ;;  %vm418_vm1 = vcmask 261120   ;;  %vm573_vm2 = vcmask 64512   ;;  %s2162_s10 = smov 120  }
  0x84   : > { %1758 = vmatprep.mubr.msk.f32.mxu0 %vm2161_vm0, %v2160_v0  ;;  %1769 = vmatprep.mubr.msk.f32.mxu1 %vm2161_vm0, %v2160_v0  ;;  %v408_v6 = vld [vmem:[#allocation8 + $0x8] sm:$0xff]  ;;  %v403_v7 = vld [vmem:[#allocation7] sm:$0xff]  ;;  %v402_v10 = vld [vmem:[%s351_s19] sm:$0xff]  ;;  %s2163_s21 = smov 96   ;;  %s2164_s3 = smov 88  }
  0x85   : > { %1751 = vmatpush3.msra.mxu0 %v406_v1  ;;  %1762 = vmatpush3.msra.mxu1 %v410_v2  ;;  %v407_v8 = vld [vmem:[#allocation8] sm:$0xff]  ;;  %s2165_s20 = smov 112   ;;  %v903_v42 = vld [vmem:[#allocation10 + $0x8] sm:$0xff]  ;;  %s2166_s14 = smov 80  }
  0x86   : > { %1752 = vmatprep.subr.mxu0 %v2160_v0  ;;  %1763 = vmatprep.subr.mxu1 %v2160_v0  ;;  %v401_v9 = vld [vmem:[%s342_s15] sm:$0xff]  ;;  %s2167_s17 = smov 104   ;;  %s2168_s22 = smov 72  }
  0x87   : > { %1753 = vmatpush3.msra.mxu0 %v405_v3  ;;  %1764 = vmatpush3.msra.mxu1 %v409_v4  ;;  %v1691_v11 = vld [vmem:[%s2544_s4] ss:$0 sm:$0xff]  ;;  %s1713_s2 = sshll.u32 %s2236_s9, 7  ;;  %s400_s13 = scalar_lea.vmem [#allocation11], %s2378_s29 }
  0x88   : > { %1754 = vmatprep.subr.mxu0 %v2160_v0  ;;  %1765 = vmatprep.subr.mxu1 %v2160_v0  ;;  %v1693_v12 = vld [vmem:[%s2545_s5] ss:$0 sm:$0xff]  ;;  %s1553_s19 = sshll.u32 %s400_s13, 4  ;;  %s1551_s16 = scalar_lea.hbm %s2548_s8, %s1713_s2  ;;  %s1554_s19 = int_to_ptr.vmem [resolvable:$true] %s1553_s19 }
  0x89   : > { %1755 = vmatpush3.msra.mxu0 %v404_v5  ;;  %1766 = vmatpush3.msra.mxu1 %v408_v6  ;;  %v737_v47 = vld [vmem:[#allocation10] sm:$0xff]  ;;  %s1540_s26 = scalar_lea.sflag [#allocation4], %s2375_s6  ;;  %p2575_p0 = scmp.ne.s32.totalorder %s2567_s25, 0 }
  0x8a   : > { %1756 = vmatprep.subr.mxu0 %v2160_v0  ;;  %1767 = vmatprep.subr.mxu1 %v2160_v0 }
  0x8b   : > { %1757 = vmatpush3.msra.mxu0 %v403_v7  ;;  %1768 = vmatpush3.msra.mxu1 %v407_v8 }
  0x8c   : > { %1759 = vmatmul.mubr.msk.f32.vlgmr.msra.gmra.mxu0 %vm418_vm1, %v401_v9  ;;  %1770 = vmatmul.mubr.msk.f32.vlgmr.msra.gmra.mxu1 %vm418_vm1, %v402_v10  ;;  %v1215_v9 = vld [vmem:[#allocation10 + $0x10] sm:$0xff] }
  0x8d   : > { %1772 = vmatprep.subr.mxu0 %v2160_v0  ;;  %1774 = vmatprep.mubr.msk.f32.mxu0 %vm2161_vm0, %v2160_v0 }
  0x8e   : > { %1777 = vmatprep.subr.mxu1 %v2160_v0  ;;  %1779 = vmatprep.mubr.msk.f32.mxu1 %vm2161_vm0, %v2160_v0 }
 0x14c   : > { %v488_v13 = vpop.f32.mrf.mxu0  ;;  %v568_v14 = vpop.f32.mrf.mxu1 }
 0x14d   : > { %v489_v15 = vadd.f32 %v1691_v11, %v488_v13  ;;  %v2430_v16 = vadd.f32 %v1693_v12, %v568_v14 }
 0x14e   : > { %v1760_v17 = vpop.f32.mrf.mxu0  ;;  %v1771_v18 = vpop.f32.mrf.mxu1 }
 0x14f   : > { %v2432_v19 = vmul.f32 0.35355338, %v489_v15  ;;  %740 = vrot.lane.b32.xlu0 %v2430_v16, %s2162_s10  ;;  %1773 = vmatpush3.xpose.msk.msra.mxu0 %vm573_vm2, %v2430_v16 }
 0x150   : > { %1782 = vmatprep.subr.mxu0 %v2160_v0 }
 0x152   : > { %1775 = vmatmul.mubr.msk.f32.vlgmr.msra.gmra.mxu0 %vm573_vm2, %v2432_v19 }
 0x153   : > { %738 = vrot.lane.b32.xlu0 %v2432_v19, %s2162_s10  ;;  %1784 = vmatprep.mubr.msk.f32.mxu0 %vm2161_vm0, %v2160_v0  ;;  %s2075_s10 = scalar_lea.vmem %s1554_s19, 128 }
 0x154   : > { %p2076_p12 = scmp.ne.s32.totalorder %s1554_s19, %s2075_s10 }
 0x156   : > { %p2077_p5 = pnand %p2076_p12, %p2575_p0 }
 0x158   : > { %p2078_p3 = pneg %p2077_p5 }
 0x1c1   : > { %v741_v20 = vpop.permute.xlu0 %740 }
 0x1c2   : > { %1783 = vmatpush3.xpose.msk.msra.mxu0 %vm573_vm2, %v741_v20 }
 0x1c3   : > { %1792 = vmatprep.subr.mxu0 %v2160_v0 }
 0x1c5   : > { %v739_v21 = vpop.permute.xlu0 %738 }
 0x1c6   : > { %1785 = vmatmul.mubr.msk.f32.vlgmr.msra.gmra.mxu0 %vm573_vm2, %v739_v21  ;;  %v1455_v21 = vld [vmem:[#allocation10 + $0x18] sm:$0xff] }
 0x1c7   : > { %1794 = vmatprep.mubr.msk.f32.mxu0 %vm2161_vm0, %v2160_v0  ;;  %1793 = vmatpush3.msra.mxu0 %v903_v42 }
 0x1c8   : > { %1802 = vmatprep.subr.mxu0 %v2160_v0 }
 0x212   : > { %v646_v22 = vpop.f32.mrf.mxu0 }
 0x213   : > { %v650_v23 = vsel %vm573_vm2, %v646_v22, -inf }
 0x214   : > { %651 = vmax.xlane.f32.xlu1 %v650_v23  ;;  %v1776_v24 = vpop.f32.mrf.mxu0 }
 0x286   : > { %v812_v25 = vpop.f32.mrf.mxu0 }
 0x287   : > { %v816_v26 = vsel %vm573_vm2, %v812_v25, -inf }
 0x288   : > { %817 = vmax.xlane.f32.xlu1 %v816_v26  ;;  %v1786_v27 = vpop.f32.mrf.mxu0 }
 0x299   : > { %661 = vrot.lane.b32.xlu1 %v2430_v16, %s2163_s21  ;;  %s2169_s21 = smov [#allocation11]  }
 0x29a   : > { %s2079_s9 = sshll.u32 %s2169_s21, 4  ;;  %s2080_s9 = int_to_ptr.vmem [resolvable:$false] %s2079_s9 }
 0x29b   : > { %s2081_s29 = scalar_lea.vmem %s2080_s9, 256  ;;  %p2082_p7 = scmp.lt.s32.totalorder %s1554_s19, %s2080_s9 }
 0x29c   : > { %p2083_p9 = scmp.lt.s32.totalorder %s2081_s29, %s2075_s10 }
 0x29d   : > { %v652_v28 = vpop.xlane.xlu1 %651 }
 0x29e   : > { %v653_v29 = vsub.f32 %v646_v22, %v652_v28  ;;  %p2084_p13 = por %p2083_p9, %p2082_p7 }
 0x2a0   : > { %v654_v30 = vmul.f32 1.442695, %v653_v29  ;;  %p2085_p8 = pnand %p2084_p13, %p2078_p3 }
 0x2a2   : > { %1925 = vpow2.f32 %v654_v30 }
 0x2af   : > { %v1926_v31 = vpop.eup %1925 }
 0x2b0   : > { %v656_v32 = vsel %vm573_vm2, %v1926_v31, 0.0 }
 0x2b1   : > { %657 = vadd.xlane.f32.xlu0 %v656_v32 }
 0x311   : > { %v818_v33 = vpop.xlane.xlu1 %817 }
 0x312   : > { %v819_v34 = vsub.f32 %v812_v25, %v818_v33 }
 0x314   : > { %v820_v35 = vmul.f32 1.442695, %v819_v34 }
 0x315   : > { %v662_v36 = vpop.permute.xlu1 %661 }
 0x316   : > { %1927 = vpow2.f32 %v820_v35  ;;  %1778 = vmatpush3.msra.mxu1 %v662_v36 }
 0x317   : > { %1787 = vmatprep.subr.mxu1 %v2160_v0 }
 0x323   : > { %v1928_v37 = vpop.eup %1927 }
 0x324   : > { %v822_v38 = vsel %vm573_vm2, %v1928_v37, 0.0 }
 0x325   : > { %823 = vadd.xlane.f32.xlu1 %v822_v38 }
 0x336   : > { %827 = vrot.lane.b32.xlu1 %v2430_v16, %s2164_s3 }
 0x33a   : > { %v658_v39 = vpop.xlane.xlu0 %657  ;;  %1052 = vrot.lane.b32.xlu1 %v2430_v16, %s2165_s20 }
 0x33b   : > { %1929 = vrcp.f32 %v658_v39 }
 0x33e   : > { %1050 = vrot.lane.b32.xlu1 %v2432_v19, %s2165_s20 }
 0x348   : > { %v1930_v40 = vpop.eup %1929 }
 0x349   : > { %v660_v41 = vmul.f32 %v1930_v40, %v1926_v31  ;;  %v1711_v31 = vld [vmem:[%s2547_s7] ss:$0 sm:$0xff] }
 0x34b   : > { %1780 = vmatmul.mubr.msk.f32.vlgmr.msra.gmra.mxu1 %vm573_vm2, %v660_v41 }
 0x34c   : > { %1789 = vmatprep.mubr.msk.f32.mxu1 %vm2161_vm0, %v2160_v0 }
 0x3ae   : > { %v824_v43 = vpop.xlane.xlu1 %823 }
 0x3af   : > { %1931 = vrcp.f32 %v824_v43 }
 0x3b2   : > { %v828_v44 = vpop.permute.xlu1 %827 }
 0x3b3   : > { %1788 = vmatpush3.msra.mxu1 %v828_v44 }
 0x3b4   : > { %1797 = vmatprep.subr.mxu1 %v2160_v0 }
 0x3b6   : > { %v1053_v50 = vpop.permute.xlu1 %1052 }
 0x3ba   : > { %v1051_v53 = vpop.permute.xlu1 %1050 }
 0x3bc   : > { %v1932_v45 = vpop.eup %1931 }
 0x3bd   : > { %v826_v46 = vmul.f32 %v1932_v45, %v1928_v37 }
 0x3bf   : > { %1790 = vmatmul.mubr.msk.f32.vlgmr.msra.gmra.mxu1 %vm573_vm2, %v826_v46 }
 0x3c0   : > { %1798 = vmatpush3.msra.mxu1 %v737_v47  ;;  %1799 = vmatprep.mubr.msk.f32.mxu1 %vm2161_vm0, %v2160_v0 }
 0x3c1   : > { %1807 = vmatprep.subr.mxu1 %v2160_v0 }
 0x40b   : > { %v733_v48 = vpop.f32.mrf.mxu1 }
 0x40c   : > { %1800 = vmatmul.mubr.msk.f32.vlgmr.msra.gmra.mxu1 %vm573_vm2, %v733_v48 }
 0x40d   : > { %v1781_v49 = vpop.f32.mrf.mxu1  ;;  %1809 = vmatprep.mubr.msk.f32.mxu1 %vm2161_vm0, %v2160_v0 }
 0x47f   : > { %v899_v51 = vpop.f32.mrf.mxu1 }
 0x480   : > { %1795 = vmatmul.mubr.msk.f32.vlgmr.msra.gmra.mxu0 %vm573_vm2, %v899_v51 }
 0x481   : > { %1803 = vmatpush3.xpose.msk.msra.mxu0 %vm573_vm2, %v1053_v50  ;;  %v1791_v52 = vpop.f32.mrf.mxu1  ;;  %1804 = vmatprep.mubr.msk.f32.mxu0 %vm2161_vm0, %v2160_v0 }
 0x482   : > { %1812 = vmatprep.subr.mxu0 %v2160_v0 }
 0x484   : > { %1805 = vmatmul.mubr.msk.f32.vlgmr.msra.gmra.mxu0 %vm573_vm2, %v1051_v53 }
 0x485   : > { %1814 = vmatprep.mubr.msk.f32.mxu0 %vm2161_vm0, %v2160_v0  ;;  %1813 = vmatpush3.msra.mxu0 %v1215_v9 }
 0x486   : > { %1822 = vmatprep.subr.mxu0 %v2160_v0 }
 0x4cc   : > { %v1046_v54 = vpop.f32.mrf.mxu1 }
 0x4ce   : > { %v1801_v55 = vpop.f32.mrf.mxu1 }
 0x540   : > { %v973_v56 = vpop.f32.mrf.mxu0 }
 0x541   : > { %v1047_v22 = vadd.f32 %v1046_v54, %v973_v56 }
 0x542   : > { %v1796_v57 = vpop.f32.mrf.mxu0 }
 0x544   : > { %v1124_v58 = vpop.f32.mrf.mxu0 }
 0x545   : > { %v1128_v59 = vsel %vm573_vm2, %v1124_v58, -inf }
 0x546   : > { %1129 = vmax.xlane.f32.xlu0 %v1128_v59  ;;  %v1806_v60 = vpop.f32.mrf.mxu0 }
 0x55c   : > { %1139 = vrot.lane.b32.xlu0 %v2430_v16, %s2166_s14 }
 0x560   : > { %1292 = vrot.lane.b32.xlu0 %v2430_v16, %s2167_s17 }
 0x564   : > { %1290 = vrot.lane.b32.xlu0 %v2432_v19, %s2167_s17 }
 0x5cf   : > { %v1130_v61 = vpop.xlane.xlu0 %1129 }
 0x5d0   : > { %v1131_v62 = vsub.f32 %v1124_v58, %v1130_v61 }
 0x5d2   : > { %v1132_v63 = vmul.f32 1.442695, %v1131_v62 }
 0x5d3   : > { %v1140_v1 = vpop.permute.xlu0 %1139 }
 0x5d4   : > { %1933 = vpow2.f32 %v1132_v63  ;;  %1808 = vmatpush3.msra.mxu1 %v1140_v1 }
 0x5d5   : > { %1817 = vmatprep.subr.mxu1 %v2160_v0 }
 0x5d7   : > { %v1293_v6 = vpop.permute.xlu0 %1292 }
 0x5db   : > { %v1291_v8 = vpop.permute.xlu0 %1290 }
 0x5e1   : > { %v1934_v2 = vpop.eup %1933 }
 0x5e2   : > { %v1134_v3 = vsel %vm573_vm2, %v1934_v2, 0.0 }
 0x5e3   : > { %1135 = vadd.xlane.f32.xlu1 %v1134_v3 }
 0x66c   : > { %v1136_v4 = vpop.xlane.xlu1 %1135 }
 0x66d   : > { %1935 = vrcp.f32 %v1136_v4 }
 0x67a   : > { %v1936_v5 = vpop.eup %1935 }
 0x67b   : > { %v1138_v7 = vmul.f32 %v1936_v5, %v1934_v2 }
 0x67d   : > { %1810 = vmatmul.mubr.msk.f32.vlgmr.msra.gmra.mxu1 %vm573_vm2, %v1138_v7 }
 0x67e   : > { %1818 = vmatpush3.xpose.msk.msra.mxu1 %vm573_vm2, %v1293_v6  ;;  %1819 = vmatprep.mubr.msk.f32.mxu1 %vm2161_vm0, %v2160_v0 }
 0x67f   : > { %1827 = vmatprep.subr.mxu1 %v2160_v0 }
 0x681   : > { %1820 = vmatmul.mubr.msk.f32.vlgmr.msra.gmra.mxu1 %vm573_vm2, %v1291_v8 }
 0x682   : > { %1829 = vmatprep.mubr.msk.f32.mxu1 %vm2161_vm0, %v2160_v0  ;;  %1828 = vmatpush3.msra.mxu1 %v1455_v21 }
 0x73d   : > { %v1211_v10 = vpop.f32.mrf.mxu1 }
 0x73e   : > { %1815 = vmatmul.mubr.msk.f32.vlgmr.msra.gmra.mxu0 %vm573_vm2, %v1211_v10 }
 0x73f   : > { %v1811_v11 = vpop.f32.mrf.mxu1  ;;  %1824 = vmatprep.mubr.msk.f32.mxu0 %vm2161_vm0, %v2160_v0 }
 0x741   : > { %v1364_v12 = vpop.f32.mrf.mxu1 }
 0x742   : > { %v1368_v13 = vsel %vm573_vm2, %v1364_v12, -inf }
 0x743   : > { %1369 = vmax.xlane.f32.xlu0 %v1368_v13  ;;  %v1821_v14 = vpop.f32.mrf.mxu1 }
 0x7cc   : > { %v1370_v15 = vpop.xlane.xlu0 %1369 }
 0x7cd   : > { %v1371_v17 = vsub.f32 %v1364_v12, %v1370_v15 }
 0x7cf   : > { %v1372_v18 = vmul.f32 1.442695, %v1371_v17 }
 0x7d1   : > { %1937 = vpow2.f32 %v1372_v18 }
 0x7de   : > { %v1938_v19 = vpop.eup %1937 }
 0x7df   : > { %v1374_v20 = vsel %vm573_vm2, %v1938_v19, 0.0 }
 0x7e0   : > { %1375 = vadd.xlane.f32.xlu1 %v1374_v20 }
 0x7f1   : > { %1379 = vrot.lane.b32.xlu1 %v2430_v16, %s2168_s22 }
 0x7fe   : > { %v1285_v0 = vpop.f32.mrf.mxu0 }
 0x7ff   : > { %v1289_v23 = vadd.f32 %v1285_v0, %v1047_v22 }
 0x800   : > { %v1816_v24 = vpop.f32.mrf.mxu0 }
 0x869   : > { %v1376_v25 = vpop.xlane.xlu1 %1375 }
 0x86a   : > { %1939 = vrcp.f32 %v1376_v25 }
 0x86d   : > { %v1380_v26 = vpop.permute.xlu1 %1379 }
 0x86e   : > { %1823 = vmatpush3.msra.mxu0 %v1380_v26 }
 0x877   : > { %v1940_v27 = vpop.eup %1939 }
 0x878   : > { %v1378_v28 = vmul.f32 %v1940_v27, %v1938_v19 }
 0x87a   : > { %1825 = vmatmul.mubr.msk.f32.vlgmr.msra.gmra.mxu0 %vm573_vm2, %v1378_v28 }
 0x93a   : > { %v1451_v29 = vpop.f32.mrf.mxu0 }
 0x93b   : > { %1830 = vmatmul.mubr.msk.f32.vlgmr.msra.gmra.mxu1 %vm573_vm2, %v1451_v29 }
 0x93c   : > { %v1826_v16 = vpop.f32.mrf.mxu0 }
 0x9fb   : > { %v1525_v30 = vpop.f32.mrf.mxu1 }
 0x9fc   : > { %v1529_v32 = vadd.f32 %v1525_v30, %v1289_v23 }
 0x9fd   : > { %v1831_v33 = vpop.f32.mrf.mxu1 }
 0x9fe   : > { %v1537_v34 = vadd.f32 %v1711_v31, %v1529_v32 }
 0xa00   : > { %1538 = vst.msk [vmem:[%s400_s13] sm:$0xff] %vm418_vm1, %v1537_v34 }
 0xa01   : > { %2088 = shalt.err (!%p2085_p8)
}
 0xa02   : > { %s2089_s3 = scalar_lea.hbm %s1551_s16, 128  ;;  %s2093_s14 = scalar_lea.hbm %s2548_s8, 256 }
 0xa03   : > { %p2090_p10 = scmp.ne.s32.totalorder %s1551_s16, %s2089_s3  ;;  %p2094_p2 = scmp.lt.s32.totalorder %s1551_s16, %s2548_s8 }
 0xa04   : > { %p2095_p4 = scmp.lt.s32.totalorder %s2093_s14, %s2089_s3 }
 0xa05   : > { %p2091_p1 = pnand %p2090_p10, %p2575_p0 }
 0xa06   : > { %p2096_p6 = por %p2095_p4, %p2094_p2 }
 0xa07   : > { %p2092_p11 = pneg %p2091_p1 }
 0xa09   : > { %p2097_p12 = pnand %p2096_p6, %p2092_p11 }
 0xa0b   : > { %2100 = shalt.err (!%p2097_p12)
}
 0xa0c   : > { %1848 = dma.vmem_to_hbm [thread:$0]  (%p2575_p0), %s1554_s19, 128, %s1551_s16, %s1540_s26  }
 0xa0d PF: > { %s1565_s23 = sand.u32 1, %s2139_s27   ;;  %p2576_p5 = scmp.ne.s32.totalorder %s2559_s12, 0 }
 0xa0e   : > { %p2577_p3 = scmp.ge.s32.totalorder %s2151_s30, 2  ;;  %s1566_s15 = scalar_lea.sflag [#allocation4], %s1565_s23 }
 0xa10   : > { %p1868_p7 = pnand %p2577_p3, %p2576_p5 }
 0xa12   : > { %p1869_p9 = pneg %p1868_p7 }
 0xa14   : > { %2134 = dma.done.wait (%p1869_p9), %s1566_s15, 128  }
 0xa15   : > { %2136 = vsyncadd (%p1869_p9), %s1566_s15, 4294967168  ;;  %s2578_s2 = sld [smem:[#allocation17_spill]]  ;;  %p25_p13 = scmp.ge.s32.totalorder %s2295_s18, 4  }
 0xa16   : > { %s2579_s29 = sld [smem:[#allocation18_spill]]  ;;  %s2580_s27 = smov %s2143_s28 }
 0xa17   : > { %s2582_s30 = smov %s2295_s18  ;;  %27 = sbr.rel (!%p25_p13) target bundleno = 12 (0xc), region = 122 }
 0xa1b   : > { %s2581_s28 = smov %s2578_s2 }
 0xa1c   :  { %1571 = vsyncpa [#allocation3], 1 }
 0xa1d   :  { %1573 = vsyncpa [#allocation3 + $0x1], 1 }
 0xa1e   :  { %1574 = vsyncpa [#allocation6], 1 }
 0xa1f   :  { %1576 = vsyncpa [#allocation6 + $0x1], 1 }
 0xa20   :  { %1577 = vsyncpa [#allocation9], 1 }
 0xa21   :  { %1578 = vsyncpa [#allocation4], 1 }
 0xa22   :  { %1580 = vsyncpa [#allocation4 + $0x1], 1 }

</bundles_post_ra>
